<compile_context>
chip_gen: v5e
topology: v5e:2x2
jax: 0.10.0
libtpu: 0.0.40
codegen_flags: <defaults>
</compile_context>

<pallas_src>
import functools
import math

import jax
import jax.numpy as jnp
from jax.experimental import pallas as pl
from jax.experimental.pallas import tpu as pltpu


def self_attention_kernel(
    x_ref,        # [1, S, D]   full sequence for this batch element (f32)
    wqkv_ref,     # [D, 3D]     fused Q|K|V weight (bf16)
    bqkv_ref,     # [1, 3D]     fused Q|K|V bias   (f32)
    wd_ref,       # [D, D]      output dense weight (bf16)
    bd_ref,       # [1, D]      output dense bias   (f32)
    gamma_ref,    # [1, D]      LayerNorm scale
    beta_ref,     # [1, D]      LayerNorm shift
    out_ref,      # [1, TQ, D]
    ctx_ref,      # VMEM scratch [TQ, D] f32 (per-head ctx written in place)
    *,
    num_heads: int,
    head_dim: int,
    eps: float,
    q_block: int,
    num_q_blocks: int,
):
    D = num_heads * head_dim
    scale = 1.0 / math.sqrt(head_dim)

    if num_q_blocks == 1:
        # Whole sequence in one grid step -> single fused QKV matmul.
        x_res = x_ref[0]                                           # [S, D] f32
        x_bf = x_res.astype(jnp.bfloat16)
        qkv = (
            jnp.dot(x_bf, wqkv_ref[...], preferred_element_type=jnp.float32)
            + bqkv_ref[...]
        )                                                          # [S, 3D] f32
        q = qkv[:, :D]
        k = qkv[:, D:2 * D]
        v = qkv[:, 2 * D:]
    else:
        # Query-tiled path (long S / second parallel axis for v7x dual TCs).
        # K/V are recomputed per query block -- the trade for bounded VMEM.
        q_start = pl.multiple_of(pl.program_id(1) * q_block, q_block)
        x_res = x_ref[0, pl.ds(q_start, q_block), :]               # [TQ, D] f32
        x_full_bf = x_ref[0].astype(jnp.bfloat16)                  # [S, D]
        q = (
            jnp.dot(x_res.astype(jnp.bfloat16), wqkv_ref[:, :D],
                    preferred_element_type=jnp.float32)
            + bqkv_ref[:, :D]
        )                                                          # [TQ, D]
        kv = (
            jnp.dot(x_full_bf, wqkv_ref[:, D:],
                    preferred_element_type=jnp.float32)
            + bqkv_ref[:, D:]
        )                                                          # [S, 2D]
        k = kv[:, :D]
        v = kv[:, D:]

    # Fold 1/sqrt(dh) into q once ([TQ, D]) instead of scaling every [TQ, S]
    # score matrix; cast matmul operands to bf16 once.
    q_bf = (q * scale).astype(jnp.bfloat16)
    k_bf = k.astype(jnp.bfloat16)
    v_bf = v.astype(jnp.bfloat16)

    # NT contraction (q @ k^T) without an explicit transpose.
    nt_dims = (((1,), (1,)), ((), ()))

    for h in range(num_heads):
        lo = h * head_dim
        hi = lo + head_dim
        qh = q_bf[:, lo:hi]                                        # [TQ, dh]
        kh = k_bf[:, lo:hi]                                        # [S, dh]
        vh = v_bf[:, lo:hi]                                        # [S, dh]

        scores = jax.lax.dot_general(
            qh, kh, nt_dims, preferred_element_type=jnp.float32)   # [TQ, S] f32
        m = jnp.max(scores, axis=-1, keepdims=True)
        e = jnp.exp(scores - m)                                    # f32
        denom = jnp.sum(e, axis=-1, keepdims=True)                 # [TQ, 1]
        # Deferred normalization: matmul the un-normalized weights, then one
        # (approx, EUP) reciprocal applied to the narrow [TQ, dh] result.
        ctx_h = jnp.dot(e.astype(jnp.bfloat16), vh,
                        preferred_element_type=jnp.float32)        # [TQ, dh]
        ctx_ref[:, lo:hi] = ctx_h * pl.reciprocal(denom, approx=True)

    # Output dense projection: single [TQ, D] @ [D, D] MXU op.
    hidden = (
        jnp.dot(ctx_ref[...].astype(jnp.bfloat16), wd_ref[...],
                preferred_element_type=jnp.float32)
        + bd_ref[...]
    )

    # Residual + LayerNorm (TF style: eps inside the sqrt), all in f32.
    h_res = hidden + x_res
    u = jnp.mean(h_res, axis=-1, keepdims=True)
    c = h_res - u
    s = jnp.mean(c * c, axis=-1, keepdims=True)
    normed = c * jax.lax.rsqrt(s + eps)
    out = gamma_ref[...] * normed + beta_ref[...]

    out_ref[0] = out.astype(out_ref.dtype)


def self_attention(x, params, *, num_heads, eps=1e-12, q_block=None):
    """x: [B, S, D] f32; params: dict of weights/biases in [in, out] layout."""
    B, S, D = x.shape
    assert D % num_heads == 0
    head_dim = D // num_heads

    if q_block is None:
        # Whole sequence per step for short S; tile queries for long S.
        q_block = S if S <= 512 else 256
    assert S % q_block == 0, "S must be divisible by q_block"
    num_q_blocks = S // q_block

    # Host-side packing: fuse Q|K|V weights/biases, ship matmul weights as
    # bf16 (halves weight DMA bytes and VMEM footprint).
    w_qkv = jnp.concatenate(
        [params["wq"], params["wk"], params["wv"]], axis=1
    ).astype(jnp.bfloat16)                                         # [D, 3D]
    b_qkv = jnp.concatenate(
        [params["bq"], params["bk"], params["bv"]], axis=1
    ).astype(jnp.float32)                                          # [1, 3D]
    wd = params["wd"].astype(jnp.bfloat16)
    bd = params["bd"].astype(jnp.float32)
    gamma = params["gamma"].astype(jnp.float32)
    beta = params["beta"].astype(jnp.float32)

    kernel = functools.partial(
        self_attention_kernel,
        num_heads=num_heads, head_dim=head_dim, eps=eps,
        q_block=q_block, num_q_blocks=num_q_blocks,
    )

    def invariant(shape):
        # Grid-invariant operand: identical block index every step, so the
        # Pallas pipeline does not re-DMA it across grid iterations.
        return pl.BlockSpec(shape, lambda b, qi: tuple(0 for _ in shape))

    in_specs = [
        pl.BlockSpec((1, S, D), lambda b, qi: (b, 0, 0)),   # x (full sequence)
        invariant((D, 3 * D)),                              # fused QKV weight
        invariant((1, 3 * D)),                              # fused QKV bias
        invariant((D, D)),                                  # dense weight
        invariant((1, D)),                                  # dense bias
        invariant((1, D)),                                  # LN gamma
        invariant((1, D)),                                  # LN beta
    ]
    out_specs = pl.BlockSpec((1, q_block, D), lambda b, qi: (b, qi, 0))

    return pl.pallas_call(
        kernel,
        out_shape=jax.ShapeDtypeStruct((B, S, D), x.dtype),
        grid=(B, num_q_blocks),
        in_specs=in_specs,
        out_specs=out_specs,
        scratch_shapes=[pltpu.VMEM((q_block, D), jnp.float32)],
        compiler_params=pltpu.CompilerParams(
            dimension_semantics=("parallel", "parallel"),
            vmem_limit_bytes=64 * 1024 * 1024,
        ),
    )(x, w_qkv, b_qkv, wd, bd, gamma, beta)


def self_attention_ref(x, params, *, num_heads, eps=1e-12):
    """Pure-JAX f32 reference mirroring the PyTorch forward (eval mode)."""
    B, S, D = x.shape
    dh = D // num_heads
    xf = x.astype(jnp.float32)

    def lin(a, w, b):
        return a @ w + b

    q = lin(xf, params["wq"], params["bq"]).reshape(B, S, num_heads, dh).transpose(0, 2, 1, 3)
    k = lin(xf, params["wk"], params["bk"]).reshape(B, S, num_heads, dh).transpose(0, 2, 1, 3)
    v = lin(xf, params["wv"], params["bv"]).reshape(B, S, num_heads, dh).transpose(0, 2, 1, 3)

    scores = jnp.einsum("bhqd,bhkd->bhqk", q, k) / math.sqrt(dh)
    probs = jax.nn.softmax(scores, axis=-1)
    ctx = jnp.einsum("bhqk,bhkd->bhqd", probs, v)
    ctx = ctx.transpose(0, 2, 1, 3).reshape(B, S, D)

    hidden = lin(ctx, params["wd"], params["bd"])
    h = hidden + xf
    u = h.mean(-1, keepdims=True)
    s = ((h - u) ** 2).mean(-1, keepdims=True)
    h = (h - u) / jnp.sqrt(s + eps)
    return params["gamma"] * h + params["beta"]


def init_params(key, input_size, hidden_size):
    assert input_size == hidden_size, "residual add requires input_size == hidden_size"
    keys = jax.random.split(key, 8)
    std = 0.02

    def w(k, shape):
        return std * jax.random.normal(k, shape, dtype=jnp.float32)

    D = hidden_size
    return {
        "wq": w(keys[0], (input_size, D)), "bq": jnp.zeros((1, D), jnp.float32),
        "wk": w(keys[1], (input_size, D)), "bk": jnp.zeros((1, D), jnp.float32),
        "wv": w(keys[2], (input_size, D)), "bv": jnp.zeros((1, D), jnp.float32),
        "wd": w(keys[3], (D, D)),          "bd": jnp.zeros((1, D), jnp.float32),
        "gamma": jnp.ones((1, D), jnp.float32),
        "beta": jnp.zeros((1, D), jnp.float32),
    }


if __name__ == "__main__":
    NUM_HEADS = 4
    key = jax.random.PRNGKey(0)
    kx, kp, kx2 = jax.random.split(key, 3)

    # Test 1: small shapes, single-query-block (fused QKV) path.
    B, S, D = 2, 8, 32
    x = jax.random.normal(kx, (B, S, D), dtype=jnp.float32)
    params = init_params(kp, D, D)

    out = jax.block_until_ready(self_attention(x, params, num_heads=NUM_HEADS))
    ref = self_attention_ref(x, params, num_heads=NUM_HEADS)
    assert out.shape == (B, S, D)
    # bf16 MXU operands + approx reciprocal -> loosen tolerance vs f32 ref.
    assert jnp.allclose(out, ref, atol=1e-2, rtol=1e-2), "mismatch vs reference (fused path)"

    # Test 2: query-tiled path (grid axis over sequence blocks).
    S2 = 16
    x2 = jax.random.normal(kx2, (B, S2, D), dtype=jnp.float32)
    out2 = jax.block_until_ready(
        self_attention(x2, params, num_heads=NUM_HEADS, q_block=8)
    )
    ref2 = self_attention_ref(x2, params, num_heads=NUM_HEADS)
    assert out2.shape == (B, S2, D)
    assert jnp.allclose(out2, ref2, atol=1e-2, rtol=1e-2), "mismatch vs reference (tiled path)"

    print("KERNEL_OK")
</pallas_src>

<mosaic_0001>
module attributes {stable_mosaic.version = 11 : i64} {
  func.func @self_attention_kernel(%arg0: i32, %arg1: i32, %arg2: memref<1x8x32xf32, #tpu.memory_space<vmem>>, %arg3: memref<32x96xbf16, #tpu.memory_space<vmem>>, %arg4: memref<1x96xf32, #tpu.memory_space<vmem>>, %arg5: memref<32x32xbf16, #tpu.memory_space<vmem>>, %arg6: memref<1x32xf32, #tpu.memory_space<vmem>>, %arg7: memref<1x32xf32, #tpu.memory_space<vmem>>, %arg8: memref<1x32xf32, #tpu.memory_space<vmem>>, %arg9: memref<1x8x32xf32, #tpu.memory_space<vmem>>, %arg10: memref<8x32xf32, #tpu.memory_space<vmem>>) attributes {dimension_semantics = [#tpu.dimension_semantics<parallel>, #tpu.dimension_semantics<parallel>], iteration_bounds = array<i64: 2, 1>, scalar_prefetch = 0 : i64, scratch_operands = 1 : i64, tpu.core_type = #tpu.core_type<tc>, window_params = [{transform_indices = @transform_0, window_bounds = array<i64: 1, 8, 32>}, {pipeline_mode = #tpu.pipeline_mode<synchronous>, transform_indices = @transform_1, window_bounds = array<i64: 32, 96>}, {pipeline_mode = #tpu.pipeline_mode<synchronous>, transform_indices = @transform_2, window_bounds = array<i64: 1, 96>}, {pipeline_mode = #tpu.pipeline_mode<synchronous>, transform_indices = @transform_3, window_bounds = array<i64: 32, 32>}, {pipeline_mode = #tpu.pipeline_mode<synchronous>, transform_indices = @transform_4, window_bounds = array<i64: 1, 32>}, {pipeline_mode = #tpu.pipeline_mode<synchronous>, transform_indices = @transform_5, window_bounds = array<i64: 1, 32>}, {pipeline_mode = #tpu.pipeline_mode<synchronous>, transform_indices = @transform_6, window_bounds = array<i64: 1, 32>}, {transform_indices = @transform_7, window_bounds = array<i64: 1, 8, 32>}]} {
    %c0 = arith.constant 0 : index
    %c0_0 = arith.constant 0 : index
    %c0_1 = arith.constant 0 : index
    %0 = vector.load %arg2[%c0, %c0_0, %c0_1] : memref<1x8x32xf32, #tpu.memory_space<vmem>>, vector<1x8x32xf32>
    %1 = vector.shape_cast %0 : vector<1x8x32xf32> to vector<8x32xf32>
    %2 = arith.truncf %1 : vector<8x32xf32> to vector<8x32xbf16>
    %c0_2 = arith.constant 0 : index
    %c0_3 = arith.constant 0 : index
    %3 = vector.load %arg3[%c0_2, %c0_3] : memref<32x96xbf16, #tpu.memory_space<vmem>>, vector<32x96xbf16>
    %cst = arith.constant dense<0.000000e+00> : vector<8x96xf32>
    %4 = tpu.matmul %2, %3, %cst {dimension_numbers = #tpu.dot_dimension_numbers<[1], [0], [0], [1], [0, 0, 1, 1], [], []>} : vector<8x32xbf16>, vector<32x96xbf16>, vector<8x96xf32> -> vector<8x96xf32>
    %c0_4 = arith.constant 0 : index
    %c0_5 = arith.constant 0 : index
    %5 = vector.load %arg4[%c0_4, %c0_5] : memref<1x96xf32, #tpu.memory_space<vmem>>, vector<1x96xf32>
    %6 = vector.broadcast %5 : vector<1x96xf32> to vector<8x96xf32>
    %7 = arith.addf %4, %6 : vector<8x96xf32>
    %8 = vector.extract_strided_slice %7 {offsets = [0, 0], sizes = [8, 32], strides = [1, 1]} : vector<8x96xf32> to vector<8x32xf32>
    %9 = vector.extract_strided_slice %7 {offsets = [0, 32], sizes = [8, 32], strides = [1, 1]} : vector<8x96xf32> to vector<8x32xf32>
    %10 = vector.extract_strided_slice %7 {offsets = [0, 64], sizes = [8, 32], strides = [1, 1]} : vector<8x96xf32> to vector<8x32xf32>
    %cst_6 = arith.constant 0.353553385 : f32
    %11 = vector.broadcast %cst_6 : f32 to vector<8x32xf32>
    %12 = arith.mulf %8, %11 : vector<8x32xf32>
    %13 = arith.truncf %12 : vector<8x32xf32> to vector<8x32xbf16>
    %14 = arith.truncf %9 : vector<8x32xf32> to vector<8x32xbf16>
    %15 = arith.truncf %10 : vector<8x32xf32> to vector<8x32xbf16>
    %16 = vector.extract_strided_slice %13 {offsets = [0, 0], sizes = [8, 8], strides = [1, 1]} : vector<8x32xbf16> to vector<8x8xbf16>
    %17 = vector.extract_strided_slice %14 {offsets = [0, 0], sizes = [8, 8], strides = [1, 1]} : vector<8x32xbf16> to vector<8x8xbf16>
    %18 = vector.extract_strided_slice %15 {offsets = [0, 0], sizes = [8, 8], strides = [1, 1]} : vector<8x32xbf16> to vector<8x8xbf16>
    %cst_7 = arith.constant dense<0.000000e+00> : vector<8x8xf32>
    %19 = tpu.matmul %16, %17, %cst_7 {dimension_numbers = #tpu.dot_dimension_numbers<[1], [1], [0], [0], [0, 0, 1, 0], [], []>} : vector<8x8xbf16>, vector<8x8xbf16>, vector<8x8xf32> -> vector<8x8xf32>
    %cst_8 = arith.constant dense<0xFF800000> : vector<8xf32>
    %20 = vector.multi_reduction <maximumf>, %19, %cst_8 [1] : vector<8x8xf32> to vector<8xf32>
    %21 = vector.shape_cast %20 : vector<8xf32> to vector<8x1xf32>
    %22 = vector.broadcast %21 : vector<8x1xf32> to vector<8x8xf32>
    %23 = arith.subf %19, %22 : vector<8x8xf32>
    %24 = math.exp %23 : vector<8x8xf32>
    %cst_9 = arith.constant dense<0.000000e+00> : vector<8xf32>
    %25 = vector.multi_reduction <add>, %24, %cst_9 [1] : vector<8x8xf32> to vector<8xf32>
    %26 = vector.shape_cast %25 : vector<8xf32> to vector<8x1xf32>
    %27 = arith.truncf %24 : vector<8x8xf32> to vector<8x8xbf16>
    %cst_10 = arith.constant dense<0.000000e+00> : vector<8x8xf32>
    %28 = tpu.matmul %27, %18, %cst_10 {dimension_numbers = #tpu.dot_dimension_numbers<[1], [0], [0], [1], [0, 0, 1, 1], [], []>} : vector<8x8xbf16>, vector<8x8xbf16>, vector<8x8xf32> -> vector<8x8xf32>
    %29 = tpu.reciprocal %26 {approx = true} : vector<8x1xf32> -> vector<8x1xf32>
    %30 = vector.broadcast %29 : vector<8x1xf32> to vector<8x8xf32>
    %31 = arith.mulf %28, %30 : vector<8x8xf32>
    %c0_11 = arith.constant 0 : index
    %c0_12 = arith.constant 0 : index
    %32 = vector.load %arg10[%c0_11, %c0_12] : memref<8x32xf32, #tpu.memory_space<vmem>>, vector<8x8xf32>
    tpu.vector_store %arg10[%c0_11, %c0_12], %31 {strides = array<i32>} : memref<8x32xf32, #tpu.memory_space<vmem>>, vector<8x8xf32>,
    %33 = vector.extract_strided_slice %13 {offsets = [0, 8], sizes = [8, 8], strides = [1, 1]} : vector<8x32xbf16> to vector<8x8xbf16>
    %34 = vector.extract_strided_slice %14 {offsets = [0, 8], sizes = [8, 8], strides = [1, 1]} : vector<8x32xbf16> to vector<8x8xbf16>
    %35 = vector.extract_strided_slice %15 {offsets = [0, 8], sizes = [8, 8], strides = [1, 1]} : vector<8x32xbf16> to vector<8x8xbf16>
    %cst_13 = arith.constant dense<0.000000e+00> : vector<8x8xf32>
    %36 = tpu.matmul %33, %34, %cst_13 {dimension_numbers = #tpu.dot_dimension_numbers<[1], [1], [0], [0], [0, 0, 1, 0], [], []>} : vector<8x8xbf16>, vector<8x8xbf16>, vector<8x8xf32> -> vector<8x8xf32>
    %cst_14 = arith.constant dense<0xFF800000> : vector<8xf32>
    %37 = vector.multi_reduction <maximumf>, %36, %cst_14 [1] : vector<8x8xf32> to vector<8xf32>
    %38 = vector.shape_cast %37 : vector<8xf32> to vector<8x1xf32>
    %39 = vector.broadcast %38 : vector<8x1xf32> to vector<8x8xf32>
    %40 = arith.subf %36, %39 : vector<8x8xf32>
    %41 = math.exp %40 : vector<8x8xf32>
    %cst_15 = arith.constant dense<0.000000e+00> : vector<8xf32>
    %42 = vector.multi_reduction <add>, %41, %cst_15 [1] : vector<8x8xf32> to vector<8xf32>
    %43 = vector.shape_cast %42 : vector<8xf32> to vector<8x1xf32>
    %44 = arith.truncf %41 : vector<8x8xf32> to vector<8x8xbf16>
    %cst_16 = arith.constant dense<0.000000e+00> : vector<8x8xf32>
    %45 = tpu.matmul %44, %35, %cst_16 {dimension_numbers = #tpu.dot_dimension_numbers<[1], [0], [0], [1], [0, 0, 1, 1], [], []>} : vector<8x8xbf16>, vector<8x8xbf16>, vector<8x8xf32> -> vector<8x8xf32>
    %46 = tpu.reciprocal %43 {approx = true} : vector<8x1xf32> -> vector<8x1xf32>
    %47 = vector.broadcast %46 : vector<8x1xf32> to vector<8x8xf32>
    %48 = arith.mulf %45, %47 : vector<8x8xf32>
    %c0_17 = arith.constant 0 : index
    %c8 = arith.constant 8 : index
    %49 = vector.load %arg10[%c0_17, %c8] : memref<8x32xf32, #tpu.memory_space<vmem>>, vector<8x8xf32>
    tpu.vector_store %arg10[%c0_17, %c8], %48 {strides = array<i32>} : memref<8x32xf32, #tpu.memory_space<vmem>>, vector<8x8xf32>,
    %50 = vector.extract_strided_slice %13 {offsets = [0, 16], sizes = [8, 8], strides = [1, 1]} : vector<8x32xbf16> to vector<8x8xbf16>
    %51 = vector.extract_strided_slice %14 {offsets = [0, 16], sizes = [8, 8], strides = [1, 1]} : vector<8x32xbf16> to vector<8x8xbf16>
    %52 = vector.extract_strided_slice %15 {offsets = [0, 16], sizes = [8, 8], strides = [1, 1]} : vector<8x32xbf16> to vector<8x8xbf16>
    %cst_18 = arith.constant dense<0.000000e+00> : vector<8x8xf32>
    %53 = tpu.matmul %50, %51, %cst_18 {dimension_numbers = #tpu.dot_dimension_numbers<[1], [1], [0], [0], [0, 0, 1, 0], [], []>} : vector<8x8xbf16>, vector<8x8xbf16>, vector<8x8xf32> -> vector<8x8xf32>
    %cst_19 = arith.constant dense<0xFF800000> : vector<8xf32>
    %54 = vector.multi_reduction <maximumf>, %53, %cst_19 [1] : vector<8x8xf32> to vector<8xf32>
    %55 = vector.shape_cast %54 : vector<8xf32> to vector<8x1xf32>
    %56 = vector.broadcast %55 : vector<8x1xf32> to vector<8x8xf32>
    %57 = arith.subf %53, %56 : vector<8x8xf32>
    %58 = math.exp %57 : vector<8x8xf32>
    %cst_20 = arith.constant dense<0.000000e+00> : vector<8xf32>
    %59 = vector.multi_reduction <add>, %58, %cst_20 [1] : vector<8x8xf32> to vector<8xf32>
    %60 = vector.shape_cast %59 : vector<8xf32> to vector<8x1xf32>
    %61 = arith.truncf %58 : vector<8x8xf32> to vector<8x8xbf16>
    %cst_21 = arith.constant dense<0.000000e+00> : vector<8x8xf32>
    %62 = tpu.matmul %61, %52, %cst_21 {dimension_numbers = #tpu.dot_dimension_numbers<[1], [0], [0], [1], [0, 0, 1, 1], [], []>} : vector<8x8xbf16>, vector<8x8xbf16>, vector<8x8xf32> -> vector<8x8xf32>
    %63 = tpu.reciprocal %60 {approx = true} : vector<8x1xf32> -> vector<8x1xf32>
    %64 = vector.broadcast %63 : vector<8x1xf32> to vector<8x8xf32>
    %65 = arith.mulf %62, %64 : vector<8x8xf32>
    %c0_22 = arith.constant 0 : index
    %c16 = arith.constant 16 : index
    %66 = vector.load %arg10[%c0_22, %c16] : memref<8x32xf32, #tpu.memory_space<vmem>>, vector<8x8xf32>
    tpu.vector_store %arg10[%c0_22, %c16], %65 {strides = array<i32>} : memref<8x32xf32, #tpu.memory_space<vmem>>, vector<8x8xf32>,
    %67 = vector.extract_strided_slice %13 {offsets = [0, 24], sizes = [8, 8], strides = [1, 1]} : vector<8x32xbf16> to vector<8x8xbf16>
    %68 = vector.extract_strided_slice %14 {offsets = [0, 24], sizes = [8, 8], strides = [1, 1]} : vector<8x32xbf16> to vector<8x8xbf16>
    %69 = vector.extract_strided_slice %15 {offsets = [0, 24], sizes = [8, 8], strides = [1, 1]} : vector<8x32xbf16> to vector<8x8xbf16>
    %cst_23 = arith.constant dense<0.000000e+00> : vector<8x8xf32>
    %70 = tpu.matmul %67, %68, %cst_23 {dimension_numbers = #tpu.dot_dimension_numbers<[1], [1], [0], [0], [0, 0, 1, 0], [], []>} : vector<8x8xbf16>, vector<8x8xbf16>, vector<8x8xf32> -> vector<8x8xf32>
    %cst_24 = arith.constant dense<0xFF800000> : vector<8xf32>
    %71 = vector.multi_reduction <maximumf>, %70, %cst_24 [1] : vector<8x8xf32> to vector<8xf32>
    %72 = vector.shape_cast %71 : vector<8xf32> to vector<8x1xf32>
    %73 = vector.broadcast %72 : vector<8x1xf32> to vector<8x8xf32>
    %74 = arith.subf %70, %73 : vector<8x8xf32>
    %75 = math.exp %74 : vector<8x8xf32>
    %cst_25 = arith.constant dense<0.000000e+00> : vector<8xf32>
    %76 = vector.multi_reduction <add>, %75, %cst_25 [1] : vector<8x8xf32> to vector<8xf32>
    %77 = vector.shape_cast %76 : vector<8xf32> to vector<8x1xf32>
    %78 = arith.truncf %75 : vector<8x8xf32> to vector<8x8xbf16>
    %cst_26 = arith.constant dense<0.000000e+00> : vector<8x8xf32>
    %79 = tpu.matmul %78, %69, %cst_26 {dimension_numbers = #tpu.dot_dimension_numbers<[1], [0], [0], [1], [0, 0, 1, 1], [], []>} : vector<8x8xbf16>, vector<8x8xbf16>, vector<8x8xf32> -> vector<8x8xf32>
    %80 = tpu.reciprocal %77 {approx = true} : vector<8x1xf32> -> vector<8x1xf32>
    %81 = vector.broadcast %80 : vector<8x1xf32> to vector<8x8xf32>
    %82 = arith.mulf %79, %81 : vector<8x8xf32>
    %c0_27 = arith.constant 0 : index
    %c24 = arith.constant 24 : index
    %83 = vector.load %arg10[%c0_27, %c24] : memref<8x32xf32, #tpu.memory_space<vmem>>, vector<8x8xf32>
    tpu.vector_store %arg10[%c0_27, %c24], %82 {strides = array<i32>} : memref<8x32xf32, #tpu.memory_space<vmem>>, vector<8x8xf32>,
    %c0_28 = arith.constant 0 : index
    %c0_29 = arith.constant 0 : index
    %84 = vector.load %arg10[%c0_28, %c0_29] : memref<8x32xf32, #tpu.memory_space<vmem>>, vector<8x32xf32>
    %85 = arith.truncf %84 : vector<8x32xf32> to vector<8x32xbf16>
    %c0_30 = arith.constant 0 : index
    %c0_31 = arith.constant 0 : index
    %86 = vector.load %arg5[%c0_30, %c0_31] : memref<32x32xbf16, #tpu.memory_space<vmem>>, vector<32x32xbf16>
    %cst_32 = arith.constant dense<0.000000e+00> : vector<8x32xf32>
    %87 = tpu.matmul %85, %86, %cst_32 {dimension_numbers = #tpu.dot_dimension_numbers<[1], [0], [0], [1], [0, 0, 1, 1], [], []>} : vector<8x32xbf16>, vector<32x32xbf16>, vector<8x32xf32> -> vector<8x32xf32>
    %c0_33 = arith.constant 0 : index
    %c0_34 = arith.constant 0 : index
    %88 = vector.load %arg6[%c0_33, %c0_34] : memref<1x32xf32, #tpu.memory_space<vmem>>, vector<1x32xf32>
    %89 = vector.broadcast %88 : vector<1x32xf32> to vector<8x32xf32>
    %90 = arith.addf %87, %89 : vector<8x32xf32>
    %91 = arith.addf %90, %1 : vector<8x32xf32>
    %cst_35 = arith.constant dense<0.000000e+00> : vector<8xf32>
    %92 = vector.multi_reduction <add>, %91, %cst_35 [1] : vector<8x32xf32> to vector<8xf32>
    %93 = vector.shape_cast %92 : vector<8xf32> to vector<8x1xf32>
    %cst_36 = arith.constant 3.200000e+01 : f32
    %94 = vector.broadcast %cst_36 : f32 to vector<8x1xf32>
    %95 = arith.divf %93, %94 : vector<8x1xf32>
    %96 = vector.broadcast %95 : vector<8x1xf32> to vector<8x32xf32>
    %97 = arith.subf %91, %96 : vector<8x32xf32>
    %98 = arith.mulf %97, %97 : vector<8x32xf32>
    %cst_37 = arith.constant dense<0.000000e+00> : vector<8xf32>
    %99 = vector.multi_reduction <add>, %98, %cst_37 [1] : vector<8x32xf32> to vector<8xf32>
    %100 = vector.shape_cast %99 : vector<8xf32> to vector<8x1xf32>
    %cst_38 = arith.constant 3.200000e+01 : f32
    %101 = vector.broadcast %cst_38 : f32 to vector<8x1xf32>
    %102 = arith.divf %100, %101 : vector<8x1xf32>
    %cst_39 = arith.constant 9.99999996E-13 : f32
    %103 = vector.broadcast %cst_39 : f32 to vector<8x1xf32>
    %104 = arith.addf %102, %103 : vector<8x1xf32>
    %105 = math.rsqrt %104 : vector<8x1xf32>
    %106 = vector.broadcast %105 : vector<8x1xf32> to vector<8x32xf32>
    %107 = arith.mulf %97, %106 : vector<8x32xf32>
    %c0_40 = arith.constant 0 : index
    %c0_41 = arith.constant 0 : index
    %108 = vector.load %arg7[%c0_40, %c0_41] : memref<1x32xf32, #tpu.memory_space<vmem>>, vector<1x32xf32>
    %109 = vector.broadcast %108 : vector<1x32xf32> to vector<8x32xf32>
    %110 = arith.mulf %109, %107 : vector<8x32xf32>
    %c0_42 = arith.constant 0 : index
    %c0_43 = arith.constant 0 : index
    %111 = vector.load %arg8[%c0_42, %c0_43] : memref<1x32xf32, #tpu.memory_space<vmem>>, vector<1x32xf32>
    %112 = vector.broadcast %111 : vector<1x32xf32> to vector<8x32xf32>
    %113 = arith.addf %110, %112 : vector<8x32xf32>
    %c0_44 = arith.constant 0 : index
    %c0_45 = arith.constant 0 : index
    %c0_46 = arith.constant 0 : index
    %114 = vector.load %arg9[%c0_44, %c0_45, %c0_46] : memref<1x8x32xf32, #tpu.memory_space<vmem>>, vector<1x8x32xf32>
    %115 = vector.shape_cast %114 : vector<1x8x32xf32> to vector<8x32xf32>
    %116 = vector.shape_cast %113 : vector<8x32xf32> to vector<1x8x32xf32>
    tpu.vector_store %arg9[%c0_44, %c0_45, %c0_46], %116 {strides = array<i32>} : memref<1x8x32xf32, #tpu.memory_space<vmem>>, vector<1x8x32xf32>,
    return
  }
  func.func @transform_0(%arg0: i32, %arg1: i32) -> (i32, i32, i32) {
    %c0_i32 = arith.constant 0 : i32
    %c0_i32_0 = arith.constant 0 : i32
    %c0_i32_1 = arith.constant 0 : i32
    return %arg0, %c0_i32, %c0_i32_0 : i32, i32, i32
  }
  func.func @transform_1(%arg0: i32, %arg1: i32) -> (i32, i32) {
    %c0_i32 = arith.constant 0 : i32
    %c0_i32_0 = arith.constant 0 : i32
    %c0_i32_1 = arith.constant 0 : i32
    return %c0_i32, %c0_i32_0 : i32, i32
  }
  func.func @transform_2(%arg0: i32, %arg1: i32) -> (i32, i32) {
    %c0_i32 = arith.constant 0 : i32
    %c0_i32_0 = arith.constant 0 : i32
    %c0_i32_1 = arith.constant 0 : i32
    return %c0_i32, %c0_i32_0 : i32, i32
  }
  func.func @transform_3(%arg0: i32, %arg1: i32) -> (i32, i32) {
    %c0_i32 = arith.constant 0 : i32
    %c0_i32_0 = arith.constant 0 : i32
    %c0_i32_1 = arith.constant 0 : i32
    return %c0_i32, %c0_i32_0 : i32, i32
  }
  func.func @transform_4(%arg0: i32, %arg1: i32) -> (i32, i32) {
    %c0_i32 = arith.constant 0 : i32
    %c0_i32_0 = arith.constant 0 : i32
    %c0_i32_1 = arith.constant 0 : i32
    return %c0_i32, %c0_i32_0 : i32, i32
  }
  func.func @transform_5(%arg0: i32, %arg1: i32) -> (i32, i32) {
    %c0_i32 = arith.constant 0 : i32
    %c0_i32_0 = arith.constant 0 : i32
    %c0_i32_1 = arith.constant 0 : i32
    return %c0_i32, %c0_i32_0 : i32, i32
  }
  func.func @transform_6(%arg0: i32, %arg1: i32) -> (i32, i32) {
    %c0_i32 = arith.constant 0 : i32
    %c0_i32_0 = arith.constant 0 : i32
    %c0_i32_1 = arith.constant 0 : i32
    return %c0_i32, %c0_i32_0 : i32, i32
  }
  func.func @transform_7(%arg0: i32, %arg1: i32) -> (i32, i32, i32) {
    %c0_i32 = arith.constant 0 : i32
    %c0_i32_0 = arith.constant 0 : i32
    return %arg0, %arg1, %c0_i32 : i32, i32, i32
  }
}

</mosaic_0001>

<bundles_post_ra>
// kernel: tpu_custom_call.1
= control target key start
LH: loop header
LB: loop body
LE: loop exit
PB: predicated region body
PF: predicated region fallthrough
CT: control target
= control target key end

     0   :  { %s1442_s0 = inlined_call_operand.hbm [shape: f32[2,8,32], index: 0, kind: input, shape index: {}]   ;;  %s1443_s1 = inlined_call_operand.hbm [shape: bf16[32,96], index: 1, kind: input, shape index: {}]   ;;  %s1444_s2 = inlined_call_operand.vmem [shape: f32[1,96], index: 2, kind: input, shape index: {}]   ;;  %s1445_s3 = inlined_call_operand.hbm [shape: bf16[32,32], index: 3, kind: input, shape index: {}]   ;;  %s1446_s4 = inlined_call_operand.vmem [shape: f32[1,32], index: 4, kind: input, shape index: {}]   ;;  %s1447_s5 = inlined_call_operand.vmem [shape: f32[1,32], index: 5, kind: input, shape index: {}]   ;;  %s1448_s6 = inlined_call_operand.vmem [shape: f32[1,32], index: 6, kind: input, shape index: {}]   ;;  %s1449_s7 = inlined_call_operand.hbm [shape: f32[2,8,32], index: 7, kind: output, shape index: {}]  }
   0x1   :  { %1450 = sst [smem:[#allocation13_spill]] %s1443_s1 }
   0x2   :  { %12 = vsyncpa [#allocation4], 0 }
   0x3   :  { %14 = vsyncpa [#allocation4 + $0x1], 0 }
   0x4   :  { %15 = vsyncpa [#allocation7], 0 }
   0x5   :  { %16 = vsyncpa [#allocation5], 0 }
   0x6   :  { %18 = vsyncpa [#allocation5 + $0x1], 0  ;;  %s1237_s24 = smov 0   ;;  %s1239_s25 = smov 0  }
   0x7   :  { %s1241_s26 = smov 0   ;;  %s1243_s27 = smov 0  }
   0x8   :  { %s1245_s28 = smov 0   ;;  %s1247_s29 = smov 0  }
   0x9 LB: > { %s829_s30 = sadd.s32 4294967295, %s1176_s29   ;;  %p831_p0 = scmp.ge.s32.totalorder %s1176_s29, 1  ;;  %s1176_s29 = sphi %s1247_s29, %s24_s29   ;;  %s1172_s28 = sphi %s1245_s28, %s1461_s28   ;;  %s1168_s27 = sphi %s1243_s27, %s1460_s27   ;;  %s1164_s26 = sphi %s1241_s26, %s1459_s26   ;;  %s1160_s25 = sphi %s1239_s25, %s1458_s25   ;;  %s1156_s24 = sphi %s1237_s24, %s1457_s24  }
   0xa   : > { %p1271_p1 = scmp.eq.s32.totalorder %s829_s30, 0  ;;  %p221_p2 = scmp.lt.s32.totalorder %s1176_s29, 3 }
   0xb   : > { %s1452_s1 = sld [smem:[#allocation13_spill]]  ;;  %s1178_s13 = smov [#allocation6]  }
   0xc   : > { %p1279_p3 = pnand %p831_p0, %p221_p2  ;;  %s234_s14 = sshll.u32 %s1178_s13, 4  ;;  %s235_s14 = int_to_ptr.vmem [resolvable:$true] %s234_s14 }
   0xd   : > { %p834_p6 = scmp.ge.s32.totalorder %s1176_s29, 2  ;;  %s249_s17 = sshll.u32 %s1445_s3, 4  ;;  %s250_s17 = int_to_ptr.hbm [resolvable:$true] %s249_s17 }
   0xe   : > { %p888_p4 = pneg %p1279_p3  ;;  %s1179_s18 = smov 64  }
   0xf   : > { %s1180_s19 = smov 4   ;;  %s1181_s20 = smov [#allocation8]  }
  0x10   : > { %p889_p5 = pnand %p888_p4, %p1271_p1  ;;  %s251_s21 = sshll.u32 %s1181_s20, 4  ;;  %s252_s21 = int_to_ptr.vmem [resolvable:$true] %s251_s21 }
  0x11   : > { %s232_s11 = sshll.u32 %s1452_s1, 4  ;;  %s36_s22 = sadd.s32 1, %s1172_s28  ;;  %s233_s11 = int_to_ptr.hbm [resolvable:$true] %s232_s11 }
  0x12   : > { %891 = dma.hbm_to_vmem [thread:$0]  (!%p889_p5), %s233_s11, 256, %s235_s14, [#allocation7], %s1179_s18, %s1179_s18, %s1180_s19  }
  0x13   : > { %894 = dma.hbm_to_vmem [thread:$0]  (!%p889_p5), %s250_s17, 256, %s252_s21, [#allocation7], %s1179_s18, %s1179_s18, %s1180_s19  }
  0x14   : > { %s830_s23 = sadd.s32 4294967294, %s1176_s29   ;;  %p38_p7 = scmp.ge.s32.totalorder %s36_s22, 2 }
  0x15   : > { %s43_s9 = sadd.s32 1, %s1164_s26  ;;  %p50_p8 = scmp.ne.s32.totalorder %s1164_s26, %s1160_s25 }
  0x16   : > { %s1463_s22 = smov (%p38_p7, %s36_s22), 0  ;;  %p51_p9 = scmp.eq.s32.totalorder %s1176_s29, 0 }
  0x17   : > { %p56_p10 = scmp.ne.s32.totalorder %s1160_s25, %s1156_s24  ;;  %s40_s10 = ssub.s32 %s1172_s28, %s1463_s22 }
  0x18   : > { %p208_p11 = scmp.eq.s32.totalorder %s829_s30, 1  ;;  %p41_p12 = scmp.eq.s32.totalorder %s40_s10, 0 }
  0x19   : > { %p1307_p13 = por %p1271_p1, %p56_p10  ;;  %p214_p2 = scmp.eq.s32.totalorder %s830_s23, 1 }
  0x1a   : > { %p1311_p0 = por %p208_p11, %p50_p8  ;;  %p52_p4 = por %p51_p9, %p50_p8 }
  0x1b   : > { %s1316_s14 = scalar_select %p41_p12, %s1164_s26, %s43_s9  }
  0x1c   : > { %p1318_p5 = por %p214_p2, %p56_p10  ;;  %s274_s16 = sand.u32 1, %s1164_s26  }
  0x1d   : > { %s836_s30 = sshll.u32 %s1172_s28, 3  ;;  %p905_p7 = scmp.lt.s32.totalorder %s1176_s29, 2 }
  0x1e   : > { %s835_s17 = sshll.u32 %s274_s16, 3  ;;  %s282_s20 = scalar_lea.hbm %s1442_s0, %s836_s30 }
  0x1f   : > { %s284_s21 = sshll.u32 %s282_s20, 4  ;;  %s278_s10 = scalar_lea.vmem [#allocation3], %s835_s17  ;;  %s285_s21 = int_to_ptr.hbm [resolvable:$true] %s284_s21 }
  0x20   : > { %s286_s1 = sshll.u32 %s278_s10, 4  ;;  %p896_p11 = pnand %p905_p7, %p52_p4  ;;  %s287_s1 = int_to_ptr.vmem [resolvable:$true] %s286_s1 }
  0x21   : > { %s275_s23 = scalar_lea.sflag [#allocation4], %s274_s16  ;;  %295 = sbr.rel (%p1279_p3) target bundleno = 1254 (0x4e6), region = 48 }
  0x22   : > { %898 = dma.hbm_to_vmem [thread:$0]  (!%p896_p11), %s285_s21, 128, %s287_s1, %s275_s23  }
  0x23   : > { %s1331_s9 = sand.u32 (!%p1279_p3), 1, %s1160_s25  }
  0x24   : > { %s838_s18 = sshll.u32 (!%p1279_p3), %s1331_s9, 3  ;;  %s298_s30 = scalar_lea.sflag (!%p1279_p3), [#allocation4], %s1331_s9 }
  0x25   : > { %s301_s17 = scalar_lea.vmem (!%p1279_p3), [#allocation3], %s838_s18 }
  0x26   : > { %1143 = dma.done.wait (%p1307_p13), %s298_s30, 128  }
  0x27   : > { %1145 = vsyncadd (%p1307_p13), %s298_s30, 4294967168 }
  0x28   : > { %1147 = dma.done.wait (%p1271_p1), [#allocation7], 512  }
  0x29   : > { %1149 = vsyncadd (%p1271_p1), [#allocation7], 4294966784  ;;  %v873_v0 = vld [vmem:[#allocation6 + $0x8] sm:$0xff]  ;;  %v872_v1 = vld [vmem:[#allocation6] sm:$0xff]  ;;  %vm366_vm0 = vcmask 261120   ;;  %s1182_s8 = smov 96  }
  0x2a   : > { %376 = vmatpush.bf16.msra.mxu0 %v873_v0  ;;  %v1345_v2 = vld [vmem:[%s301_s17] sm:$0xff]  ;;  %v976_v4 = vld [vmem:[%s1444_s2] ss:$0 sm:$0xff]  ;;  %s1183_s11 = smov 104   ;;  %s1184_s16 = smov 120   ;;  %vm391_vm1 = vcmask 64512  }
  0x2b   : > { %v345_v3 = vpack.c.bf16 %v1345_v2, %v1345_v2  ;;  %s1185_s19 = smov 88   ;;  %s1186_s20 = smov 80   ;;  %vm426_vm2 = vcmask 1043456   ;;  %vm509_vm3 = vcmask 130112   ;;  %vm571_vm4 = vcmask 195712  }
  0x2c   : > { %s1187_s21 = smov 72   ;;  %s1188_s10 = smov 112   ;;  %vm633_vm5 = vcmask 261312  }
  0x2d   : > { %s1189_s23 = smov 64   ;;  %s1190_s30 = smov 56  }
  0x2e   : > { %377 = vmatpush.bf16.msra.mxu0 %v872_v1  ;;  %s1191_s17 = smov 48   ;;  %s1192_s1 = smov 40  }
  0x2f   : > { %s1193_s12 = smov 8  }
  0x31   : > { %850 = vmatmul.msk.bf16.vlgmr.msra.gmra.mxu0 %vm366_vm0, %v345_v3 }
  0xae   : > { %v379_v5 = vpop.f32.mrf.mxu0 }
  0xaf   : > { %v380_v6 = vadd.f32 %v976_v4, %v379_v5 }
  0xb1   : > { %v383_v7 = vmul.f32 0.35355338, %v380_v6  ;;  %v385_v8 = vpack.c.bf16 %v380_v6, %v380_v6 }
  0xb3   : > { %v384_v9 = vpack.c.bf16 %v383_v7, %v383_v7  ;;  %v387_v10 = vunpack.c.l.b16 %v385_v8 }
  0xb5   : > { %v1353_v11 = vpack.c.b16 %v387_v10, %v387_v10  ;;  %v447_v12 = vunpack.c.l.b16 %v384_v9 }
  0xb6   : > { %v381_v13 = vpop.f32.mrf.mxu0 }
  0xb7   : > { %389 = vrot.lane.b32.xlu0 %v1353_v11, %s1182_s8  ;;  %v448_v14 = vpack.c.b16 %v447_v12, %v447_v12  ;;  %s1194_s8 = smov 16  }
  0xb9   : > { %573 = vrot.lane.b32.xlu2 %v448_v14, %s1183_s11  ;;  %449 = vrot.lane.b32.xlu1 %v448_v14, %s1184_s16  ;;  %s1195_s11 = smov 24   ;;  %s715_s16 = scalar_lea.sflag [#allocation5], %s1331_s9 }
  0xbf   : > { %451 = vrot.lane.b32.xlu0 %v1353_v11, %s1185_s19 }
  0xc1   : > { %513 = vrot.lane.b32.xlu2 %v1353_v11, %s1186_s20  ;;  %575 = vrot.lane.b32.xlu1 %v1353_v11, %s1187_s21  ;;  %s869_s20 = sshll.u32 %s1168_s27, 3  ;;  %s342_s27 = scalar_lea.vmem [#allocation9], %s838_s18 }
  0xc2   : > { %s1110_s18 = scalar_lea.hbm %s1449_s7, 16 }
  0xc7   : > { %511 = vrot.lane.b32.xlu0 %v448_v14, %s1188_s10 }
  0xc9   : > { %421 = vrot.lane.b32.xlu2 %v1353_v11, %s1189_s23 }
  0xd1   : > { %482 = vrot.lane.b32.xlu2 %v1353_v11, %s1190_s30 }
 0x113   : > { %v574_v15 = vpop.permute.xlu2 %573 }
 0x11b   : > { %v514_v16 = vpop.permute.xlu2 %513 }
 0x11c   : > { %v519_v17 = vsel %vm391_vm1, %v514_v16, 0 }
 0x11d   : > { %528 = vmatpush.bf16.xpose.msrb.mxu0 %v519_v17 }
 0x123   : > { %v422_v18 = vpop.permute.xlu2 %421 }
 0x124   : > { %v428_v19 = vsel %vm426_vm2, %v422_v18, 0 }
 0x125   : > { %437 = vmatpush.bf16.msra.mxu2 %v428_v19 }
 0x129   : > { %v390_v20 = vpop.permute.xlu0 %389 }
 0x12a   : > { %v396_v21 = vsel %vm391_vm1, %v390_v20, 0 }
 0x12b   : > { %405 = vmatpush.bf16.xpose.msra.mxu1 %v396_v21  ;;  %v483_v22 = vpop.permute.xlu2 %482  ;;  %v450_v23 = vpop.permute.xlu1 %449 }
 0x12c   : > { %v488_v24 = vsel %vm426_vm2, %v483_v22, 0 }
 0x12d   : > { %497 = vmatpush.bf16.msrb.mxu2 %v488_v24 }
 0x131   : > { %v452_v25 = vpop.permute.xlu0 %451 }
 0x132   : > { %851 = vmatmul.msk.bf16.vlgmr.msra.gmra.mxu1 %vm391_vm1, %v384_v9  ;;  %v457_v26 = vsel %vm391_vm1, %v452_v25, 0 }
 0x133   : > { %466 = vmatpush.bf16.xpose.msra.mxu3 %v457_v26  ;;  %v576_v27 = vpop.permute.xlu1 %575 }
 0x134   : > { %v581_v28 = vsel %vm391_vm1, %v576_v27, 0  ;;  %v875_v27 = vld [vmem:[#allocation8 + $0x8] sm:$0xff] }
 0x135   : > { %666 = vmatpush.bf16.msra.mxu0 %v875_v27 }
 0x139   : > { %v512_v29 = vpop.permute.xlu0 %511 }
 0x13a   : > { %853 = vmatmul.msk.bf16.vlgmr.msra.gmra.mxu3 %vm391_vm1, %v450_v23  ;;  %855 = vmatmul.msk.bf16.vlgmr.msrb.gmra.mxu0 %vm391_vm1, %v512_v29 }
 0x13b   : > { %590 = vmatpush.bf16.xpose.msrb.mxu3 %v581_v28  ;;  %v874_v28 = vld [vmem:[#allocation8] sm:$0xff] }
 0x13c   : > { %667 = vmatpush.bf16.msra.mxu0 %v874_v28 }
 0x14a   : > { %857 = vmatmul.msk.bf16.vlgmr.msrb.gmra.mxu3 %vm391_vm1, %v574_v15 }
 0x1af   : > { %v407_v30 = vpop.f32.mrf.mxu1 }
 0x1b0   : > { %v411_v31 = vsel %vm391_vm1, %v407_v30, -inf }
 0x1b1   : > { %412 = vmax.xlane.f32.xlu1 %v411_v31 }
 0x1b7   : > { %v409_v32 = vpop.f32.mrf.mxu1  ;;  %v530_v33 = vpop.f32.mrf.mxu0 }
 0x1b8   : > { %v534_v34 = vsel %vm391_vm1, %v530_v33, -inf }
 0x1b9   : > { %535 = vmax.xlane.f32.xlu1 %v534_v34  ;;  %v977_v34 = vld [vmem:[%s1446_s4] ss:$0 sm:$0xff] }
 0x1bd   : > { %v468_v35 = vpop.f32.mrf.mxu3 }
 0x1be   : > { %v472_v36 = vsel %vm391_vm1, %v468_v35, -inf }
 0x1bf   : > { %v532_v37 = vpop.f32.mrf.mxu0  ;;  %473 = vmax.xlane.f32.xlu0 %v472_v36 }
 0x1c5   : > { %v470_v38 = vpop.f32.mrf.mxu3 }
 0x1cd   : > { %v592_v39 = vpop.f32.mrf.mxu3 }
 0x1ce   : > { %v596_v40 = vsel %vm391_vm1, %v592_v39, -inf }
 0x1cf   : > { %597 = vmax.xlane.f32.xlu2 %v596_v40  ;;  %v1196_v40 = vmov 32.0  }
 0x1d2   : > { %544 = vrot.lane.b32.xlu1 %v1353_v11, %s1191_s17  ;;  %s726_s17 = scalar_lea.hbm %s1449_s7, %s869_s20 }
 0x1d3   : > { %606 = vrot.lane.b32.xlu0 %v1353_v11, %s1192_s1 }
 0x1d5   : > { %v594_v41 = vpop.f32.mrf.mxu3 }
 0x224   : > { %v413_v42 = vpop.xlane.xlu1 %412 }
 0x225   : > { %v414_v43 = vsub.f32 %v407_v30, %v413_v42 }
 0x227   : > { %v415_v44 = vmul.f32 1.442695, %v414_v43 }
 0x229   : > { %980 = vpow2.f32 %v415_v44 }
 0x22c   : > { %v536_v47 = vpop.xlane.xlu1 %535 }
 0x22d   : > { %v537_v50 = vsub.f32 %v530_v33, %v536_v47 }
 0x22f   : > { %v981_v45 = vpop.eup %980  ;;  %v538_v52 = vmul.f32 1.442695, %v537_v50 }
 0x230   : > { %v420_v46 = vpack.c.bf16 %v981_v45, %v981_v45  ;;  %v417_v5 = vsel %vm391_vm1, %v981_v45, 0.0 }
 0x232   : > { %v474_v48 = vpop.xlane.xlu0 %473  ;;  %852 = vmatmul.msk.bf16.vlgmr.msra.gmra.mxu2 %vm391_vm1, %v420_v46 }
 0x233   : > { %v475_v49 = vsub.f32 %v468_v35, %v474_v48 }
 0x235   : > { %v476_v51 = vmul.f32 1.442695, %v475_v49 }
 0x237   : > { %982 = vpow2.f32 %v476_v51 }
 0x238   : > { %984 = vpow2.f32 %v538_v52 }
 0x23d   : > { %v983_v53 = vpop.eup %982 }
 0x23e   : > { %v478_v54 = vsel %vm391_vm1, %v983_v53, 0.0  ;;  %v481_v55 = vpack.c.bf16 %v983_v53, %v983_v53  ;;  %v985_v57 = vpop.eup %984 }
 0x23f   : > { %479 = vadd.xlane.f32.xlu2 %v478_v54  ;;  %v540_v0 = vsel %vm391_vm1, %v985_v57, 0.0  ;;  %v543_v1 = vpack.c.bf16 %v985_v57, %v985_v57 }
 0x242   : > { %v598_v56 = vpop.xlane.xlu2 %597  ;;  %854 = vmatmul.msk.bf16.vlgmr.msrb.gmra.mxu2 %vm391_vm1, %v481_v55 }
 0x243   : > { %v599_v58 = vsub.f32 %v592_v39, %v598_v56 }
 0x244   : > { %v545_v59 = vpop.permute.xlu1 %544 }
 0x245   : > { %v600_v60 = vmul.f32 1.442695, %v599_v58  ;;  %v607_v61 = vpop.permute.xlu0 %606  ;;  %v550_v62 = vsel %vm426_vm2, %v545_v59, 0 }
 0x246   : > { %v612_v63 = vsel %vm426_vm2, %v607_v61, 0  ;;  %559 = vmatpush.bf16.msrb.mxu1 %v550_v62 }
 0x247   : > { %986 = vpow2.f32 %v600_v60  ;;  %621 = vmatpush.bf16.msra.mxu2 %v612_v63  ;;  %541 = vadd.xlane.f32.xlu2 %v540_v0  ;;  %v978_v60 = vld [vmem:[%s1447_s5] ss:$0 sm:$0xff] }
 0x248   : > { %v979_v63 = vld [vmem:[%s1448_s6] ss:$0 sm:$0xff] }
 0x249   : > { %856 = vmatmul.msk.bf16.vlgmr.msrb.gmra.mxu1 %vm391_vm1, %v543_v1 }
 0x24d   : > { %v987_v3 = vpop.eup %986 }
 0x24e   : > { %v602_v4 = vsel %vm391_vm1, %v987_v3, 0.0  ;;  %v605_v6 = vpack.c.bf16 %v987_v3, %v987_v3 }
 0x24f   : > { %603 = vadd.xlane.f32.xlu0 %v602_v4  ;;  %418 = vadd.xlane.f32.xlu2 %v417_v5 }
 0x252   : > { %858 = vmatmul.msk.bf16.vlgmr.msra.gmra.mxu2 %vm391_vm1, %v605_v6 }
 0x2b2   : > { %v480_v7 = vpop.xlane.xlu2 %479 }
 0x2b3   : > { %988 = vrcp.f32 %v480_v7 }
 0x2b5   : > { %v439_v8 = vpop.f32.mrf.mxu2 }
 0x2b9   : > { %v989_v12 = vpop.eup %988 }
 0x2ba   : > { %v542_v9 = vpop.xlane.xlu2 %541 }
 0x2bb   : > { %990 = vrcp.f32 %v542_v9 }
 0x2bd   : > { %v441_v10 = vpop.f32.mrf.mxu2 }
 0x2c1   : > { %v991_v14 = vpop.eup %990 }
 0x2c2   : > { %v419_v11 = vpop.xlane.xlu2 %418  ;;  %v604_v20 = vpop.xlane.xlu0 %603 }
 0x2c3   : > { %992 = vrcp.f32 %v419_v11 }
 0x2c4   : > { %994 = vrcp.f32 %v604_v20 }
 0x2c5   : > { %v499_v13 = vpop.f32.mrf.mxu2  ;;  %996 = vrcp.f32 %v1196_v40 }
 0x2c6   : > { %v504_v15 = vmul.f32 %v989_v12, %v499_v13  ;;  %v561_v16 = vpop.f32.mrf.mxu1 }
 0x2c7   : > { %v566_v17 = vmul.f32 %v991_v14, %v561_v16 }
 0x2c8   : > { %506 = vrot.lane.b32.xlu1 %v504_v15, %s1193_s12 }
 0x2c9   : > { %568 = vrot.lane.b32.xlu2 %v566_v17, %s1194_s8  ;;  %v993_v18 = vpop.eup %992  ;;  %s728_s8 = sshll.u32 %s342_s27, 4  ;;  %s729_s8 = int_to_ptr.vmem [resolvable:$true] %s728_s8 }
 0x2ca   : > { %v444_v19 = vmul.f32 %v993_v18, %v439_v8  ;;  %v995_v23 = vpop.eup %994 }
 0x2cb   : > { %v997_v41 = vpop.eup %996 }
 0x2cc   : > { %445 = vst.msk [vmem:[#allocation2] sm:$0xff] %vm391_vm1, %v444_v19  ;;  %v678_v42 = vmul.f32 32.0, %v997_v41  ;;  %vm682_vm6 = vweird.f32 %v997_v41 }
 0x2cd   : > { %v501_v21 = vpop.f32.mrf.mxu2 }
 0x2ce   : > { %v563_v22 = vpop.f32.mrf.mxu1  ;;  %v679_v43 = vsub.f32 1.0, %v678_v42 }
 0x2d0   : > { %v680_v44 = vmul.f32 %v997_v41, %v679_v43 }
 0x2d2   : > { %v681_v45 = vadd.f32 %v997_v41, %v680_v44 }
 0x2d4   : > { %v683_v46 = vsel %vm682_vm6, %v997_v41, %v681_v45 }
 0x2d5   : > { %v623_v24 = vpop.f32.mrf.mxu2 }
 0x2d6   : > { %v628_v25 = vmul.f32 %v995_v23, %v623_v24 }
 0x2d8   : > { %630 = vrot.lane.b32.xlu1 %v628_v25, %s1195_s11  ;;  %s730_s11 = sshll.u32 %s726_s17, 4  ;;  %s731_s11 = int_to_ptr.hbm [resolvable:$true] %s730_s11 }
 0x2d9   : > { %s1104_s19 = sshra.s32 %s731_s11, 4  ;;  %s1105_s19 = int_to_ptr.hbm [resolvable:$true] %s1104_s19 }
 0x2da   : > { %s1106_s20 = scalar_lea.hbm %s1105_s19, 8  ;;  %p1111_p9 = scmp.lt.s32.totalorder %s1105_s19, %s1449_s7 }
 0x2db   : > { %p1107_p1 = scmp.ne.s32.totalorder %s1105_s19, %s1106_s20  ;;  %p1112_p10 = scmp.lt.s32.totalorder %s1110_s18, %s1106_s20 }
 0x2dd   : > { %v625_v26 = vpop.f32.mrf.mxu2  ;;  %p1108_p3 = pnand %p1107_p1, %p1311_p0  ;;  %p1113_p12 = por %p1112_p10, %p1111_p9 }
 0x2df   : > { %p1109_p8 = pneg %p1108_p3 }
 0x2e1   : > { %p1114_p13 = pnand %p1113_p12, %p1109_p8 }
 0x323   : > { %v569_v30 = vpop.permute.xlu2 %568 }
 0x33a   : > { %v507_v29 = vpop.permute.xlu1 %506 }
 0x33b   : > { %510 = vst.msk [vmem:[#allocation2] sm:$0xff] %vm509_vm3, %v507_v29 }
 0x33c   : > { %572 = vst.msk [vmem:[#allocation2] sm:$0xff] %vm571_vm4, %v569_v30 }
 0x34a   : > { %v631_v31 = vpop.permute.xlu1 %630 }
 0x34b   : > { %634 = vst.msk [vmem:[#allocation2] sm:$0xff] %vm633_vm5, %v631_v31 }
 0x352   : > { %v635_v32 = vld [vmem:[#allocation2] sm:$0xff] }
 0x353   : > { %v636_v33 = vpack.c.bf16 %v635_v32, %v635_v32 }
 0x355   : > { %867 = vmatmul.msk.bf16.vlgmr.msra.gmra.mxu0 %vm366_vm0, %v636_v33 }
 0x3d2   : > { %v669_v35 = vpop.f32.mrf.mxu0 }
 0x3d3   : > { %v670_v36 = vadd.f32 %v977_v34, %v669_v35 }
 0x3d5   : > { %v673_v37 = vadd.f32 %v670_v36, %v1345_v2 }
 0x3d7   : > { %v674_v38 = vsel %vm366_vm0, %v673_v37, 0.0 }
 0x3d8   : > { %675 = vadd.xlane.f32.xlu1 %v674_v38 }
 0x3da   : > { %v671_v39 = vpop.f32.mrf.mxu0 }
 0x44b   : > { %v676_v47 = vpop.xlane.xlu1 %675 }
 0x44c   : > { %v684_v48 = vmul.f32 %v683_v46, %v676_v47 }
 0x44e   : > { %v685_v49 = vsub.f32 %v673_v37, %v684_v48 }
 0x450   : > { %v686_v50 = vmul.f32 %v685_v49, %v685_v49 }
 0x452   : > { %v687_v2 = vsel %vm366_vm0, %v686_v50, 0.0 }
 0x453   : > { %688 = vadd.xlane.f32.xlu2 %v687_v2 }
 0x4c6   : > { %v689_v51 = vpop.xlane.xlu2 %688 }
 0x4c7   : > { %v690_v52 = vmul.f32 %v689_v51, %v683_v46 }
 0x4c9   : > { %v691_v53 = vadd.f32 1e-12, %v690_v52 }
 0x4cb   : > { %998 = vrsqrt.f32 %v691_v53  ;;  %vm698_vm8 = vweird.f32 %v691_v53 }
 0x4d1   : > { %v999_v54 = vpop.eup %998 }
 0x4d2   : > { %v693_v55 = vmul.f32 %v999_v54, %v691_v53  ;;  %vm699_vm7 = vweird.f32 %v999_v54 }
 0x4d3   : > { %vm700_vm9 = vmor %vm698_vm8, %vm699_vm7 }
 0x4d4   : > { %v694_v56 = vmul.f32 %v999_v54, %v693_v55 }
 0x4d6   : > { %v695_v57 = vmul.f32 0.5, %v694_v56 }
 0x4d8   : > { %v696_v58 = vsub.f32 1.5, %v695_v57 }
 0x4da   : > { %v697_v59 = vmul.f32 %v999_v54, %v696_v58 }
 0x4dc   : > { %v701_v61 = vsel %vm700_vm9, %v999_v54, %v697_v59 }
 0x4dd   : > { %v702_v62 = vmul.f32 %v701_v61, %v685_v49 }
 0x4df   : > { %v707_v0 = vmul.f32 %v978_v60, %v702_v62 }
 0x4e1   : > { %v712_v1 = vadd.f32 %v979_v63, %v707_v0 }
 0x4e3   : > { %713 = vst.msk [vmem:[%s342_s27] sm:$0xff] %vm366_vm0, %v712_v1 }
 0x4e4   : > { %1117 = shalt.err (!%p1114_p13)
}
 0x4e5   : > { %886 = dma.vmem_to_hbm [thread:$0]  (%p1311_p0), %s729_s8, 128, %s731_s11, %s715_s16  }
 0x4e6 PF: > { %s742_s9 = sand.u32 1, %s1156_s24   ;;  %p900_p2 = pnand %p834_p6, %p1318_p5 }
 0x4e7   : > { %s743_s17 = scalar_lea.sflag [#allocation5], %s742_s9 }
 0x4e8   : > { %p901_p4 = pneg %p900_p2 }
 0x4ea   : > { %1151 = dma.done.wait (%p901_p4), %s743_s17, 128  }
 0x4eb   : > { %1153 = vsyncadd (%p901_p4), %s743_s17, 4294967168  ;;  %s24_s29 = sadd.s32 1, %s1176_s29   ;;  %s1457_s24 = smov %s1160_s25 }
 0x4ec   : > { %p21_p7 = scmp.ge.s32.totalorder %s24_s29, 4   ;;  %s1458_s25 = smov %s1164_s26 }
 0x4ed   : > { %s1459_s26 = smov %s1316_s14  ;;  %s1460_s27 = smov %s1172_s28 }
 0x4ee   : > { %s1461_s28 = smov %s1463_s22  ;;  %23 = sbr.rel (!%p21_p7) target bundleno = 9 (0x9), region = 101 }
 0x4f3   :  { %749 = vsyncpa [#allocation4], 1 }
 0x4f4   :  { %751 = vsyncpa [#allocation4 + $0x1], 1 }
 0x4f5   :  { %752 = vsyncpa [#allocation7], 1 }
 0x4f6   :  { %753 = vsyncpa [#allocation5], 1 }
 0x4f7   :  { %755 = vsyncpa [#allocation5 + $0x1], 1 }

</bundles_post_ra>
